<compile_context>
chip_gen: v6e
topology: v6e:2x2x1
jax: 0.10.0
libtpu: 0.0.40
codegen_flags: <defaults>
</compile_context>

<pallas_src>
import math

import jax
import jax.numpy as jnp
from jax import lax
from jax.experimental import pallas as pl
from jax.experimental.pallas import tpu as pltpu


def _make_layernorm_kernel(eps, feat, pack):
    """Kernel factory: eps / feat / pack are baked-in Python constants.

    feat == 1 is guarded (the unbiased-std reference would give NaN/Inf there;
    we return finite values instead -- intentional, documented deviation).
    """
    inv_n = 1.0 / float(feat)
    inv_nm1 = 1.0 / float(max(feat - 1, 1))
    lanes = pack * feat
    hi = lax.Precision.HIGHEST  # keep f32 precision through the 0/1 matmuls

    def kernel(x_ref, a_ref, b_ref, o_ref):
        x = x_ref[...].astype(jnp.float32)      # (T, lanes)
        a = a_ref[...].astype(jnp.float32)      # (1, lanes)
        b = b_ref[...].astype(jnp.float32)      # (1, lanes)

        if pack == 1:
            # Plain per-row reduction over the (full) feature axis.
            s = jnp.sum(x, axis=-1, keepdims=True)                   # (T, 1)
            sq = jnp.sum(x * x, axis=-1, keepdims=True)              # (T, 1)
            mean = s * inv_n
            var = jnp.maximum((sq - mean * s) * inv_nm1, 0.0)        # unbiased
            inv = 1.0 / (jnp.sqrt(var) + eps)                        # exact
            o_ref[...] = (a * ((x - mean) * inv) + b).astype(o_ref.dtype)
        else:
            # `pack` original rows live side-by-side in the 128 lanes of each
            # packed row.  Segmented moments / broadcasts via 0/1 segment
            # matrices (no in-kernel reshapes, no masked stores).
            lane_s = lax.broadcasted_iota(jnp.int32, (lanes, pack), 0)
            seg_s = lax.broadcasted_iota(jnp.int32, (lanes, pack), 1)
            S = ((lane_s >= seg_s * feat) &
                 (lane_s < (seg_s + 1) * feat)).astype(jnp.float32)   # (lanes, pack)
            lane_t = lax.broadcasted_iota(jnp.int32, (pack, lanes), 1)
            seg_t = lax.broadcasted_iota(jnp.int32, (pack, lanes), 0)
            ST = ((lane_t >= seg_t * feat) &
                  (lane_t < (seg_t + 1) * feat)).astype(jnp.float32)  # (pack, lanes)

            s = jnp.dot(x, S, precision=hi,
                        preferred_element_type=jnp.float32)           # (T, pack)
            sq = jnp.dot(x * x, S, precision=hi,
                         preferred_element_type=jnp.float32)          # (T, pack)
            mean = s * inv_n
            var = jnp.maximum((sq - mean * s) * inv_nm1, 0.0)
            inv = 1.0 / (jnp.sqrt(var) + eps)                         # (T, pack)
            scale = jnp.dot(inv, ST, precision=hi,
                            preferred_element_type=jnp.float32)       # (T, lanes)
            shift = jnp.dot(-(mean * inv), ST, precision=hi,
                            preferred_element_type=jnp.float32)       # (T, lanes)
            # a * (x - mean)/ (std+eps) + b  ==  a*(x*scale + shift) + b
            o_ref[...] = (a * (x * scale + shift) + b).astype(o_ref.dtype)

    return kernel


def _vmem_capacity_bytes():
    try:
        return int(pltpu.get_tpu_info().vmem_capacity_bytes)
    except Exception:
        return 64 << 20  # conservative default (v7x per-core VMEM)


def _round_up(x, m):
    return ((x + m - 1) // m) * m


def _pick_tile_rows(rows, lanes, itemsize, vmem_bytes):
    """Byte-target block sizing, generation-aware, with VMEM headroom."""
    if vmem_bytes <= (80 << 20):            # v7x-class: 64 MiB per TensorCore
        block_target, budget = 3 << 20, 48 << 20
    else:                                    # v5e / v6e: 128 MiB
        block_target, budget = 6 << 20, 100 << 20

    row_io = max(lanes * itemsize, 1)
    # Per tile row: 2x double-buffered input + 2x output blocks (io dtype)
    # plus ~3 f32 working copies of the tile.
    per_row = lanes * (4 * itemsize + 3 * 4)

    tile = block_target // row_io
    tile = min(tile, budget // max(per_row, 1))
    tile = max(16, (tile // 16) * 16)        # sublane / bf16-packing friendly

    if tile >= rows:
        tile = rows                          # full-extent block (always legal)
    elif rows >= 4 * 16:
        # >= 4 grid steps => >= 2 per TensorCore on v7x megacore, so each core
        # overlaps input DMA with compute.
        tile = min(tile, _round_up(pl.cdiv(rows, 4), 16))

    # TODO(synk): for huge F where even a 16-row tile (+ f32 temps) blows the
    # VMEM budget, add a second grid axis over F-chunks with sum/sumsq
    # accumulators and finalize on the last chunk.
    return tile, budget


def layer_norm(x, a_2, b_2, eps=1e-6, tile_rows=None):
    """x: (..., F). a_2, b_2: (F,). Returns same shape/dtype as x."""
    orig_shape = x.shape
    feat = int(orig_shape[-1])
    rows = int(math.prod(orig_shape[:-1])) if len(orig_shape) > 1 else 1

    # Lane-dense packing: view (rows, F) as (rows/k, k*F) when F < 128 divides
    # 128 and rows % k == 0.  Row-major reshape => free (no data movement).
    pack = 1
    if 0 < feat < 128 and 128 % feat == 0:
        k = 128 // feat
        if rows % k == 0:
            pack = k
    lanes = pack * feat
    rows_p = rows // pack

    x2d = x.reshape(rows_p, lanes)
    a2d = jnp.tile(jnp.reshape(a_2, (1, feat)), (1, pack))
    b2d = jnp.tile(jnp.reshape(b_2, (1, feat)), (1, pack))

    itemsize = jnp.dtype(x.dtype).itemsize
    vmem_bytes = _vmem_capacity_bytes()
    picked, budget = _pick_tile_rows(rows_p, lanes, itemsize, vmem_bytes)
    if tile_rows is None:
        tile_rows = picked

    grid = (pl.cdiv(rows_p, tile_rows),)

    io_block = tile_rows * lanes * itemsize
    f32_block = tile_rows * lanes * 4
    need = 4 * io_block + 3 * f32_block + (16 << 20)   # dbl-buffered io + temps + headroom
    vmem_limit = int(min(max(need, 32 << 20), budget))

    kernel = _make_layernorm_kernel(float(eps), feat, pack)

    out = pl.pallas_call(
        kernel,
        out_shape=jax.ShapeDtypeStruct((rows_p, lanes), x.dtype),
        grid_spec=pltpu.PrefetchScalarGridSpec(
            num_scalar_prefetch=0,
            grid=grid,
            in_specs=[
                pl.BlockSpec((tile_rows, lanes), lambda i: (i, 0)),
                pl.BlockSpec((1, lanes), lambda i: (0, 0)),   # a_2 (tiled), fetched once
                pl.BlockSpec((1, lanes), lambda i: (0, 0)),   # b_2 (tiled), fetched once
            ],
            out_specs=pl.BlockSpec((tile_rows, lanes), lambda i: (i, 0)),
        ),
        compiler_params=pltpu.CompilerParams(
            dimension_semantics=("parallel",),
            vmem_limit_bytes=vmem_limit,
        ),
    )(x2d, a2d, b2d)

    return out.reshape(orig_shape)


if __name__ == "__main__":
    key = jax.random.PRNGKey(0)
    batch, seq, features = 2, 8, 32
    x = jax.random.normal(key, (batch, seq, features), dtype=jnp.float32)

    # Deterministic parameter init, per the module's __init__.
    a_2 = jnp.ones((features,), dtype=jnp.float32)
    b_2 = jnp.zeros((features,), dtype=jnp.float32)
    eps = 1e-6

    y = jax.block_until_ready(layer_norm(x, a_2, b_2, eps))

    # Reference in plain JAX (matches torch: unbiased std, eps added to std).
    mean = jnp.mean(x, axis=-1, keepdims=True)
    var_unb = jnp.sum((x - mean) ** 2, axis=-1, keepdims=True) / (features - 1)
    ref = a_2 * (x - mean) / (jnp.sqrt(var_unb) + eps) + b_2

    err = float(jnp.max(jnp.abs(y - ref)))
    assert err < 1e-4, f"mismatch vs reference (max abs err {err})"
    print("KERNEL_OK")
</pallas_src>

<mosaic_0001>
module attributes {stable_mosaic.version = 11 : i64} {
  func.func @kernel(%arg0: i32, %arg1: memref<4x128xf32, #tpu.memory_space<vmem>>, %arg2: memref<1x128xf32, #tpu.memory_space<vmem>>, %arg3: memref<1x128xf32, #tpu.memory_space<vmem>>, %arg4: memref<4x128xf32, #tpu.memory_space<vmem>>) attributes {dimension_semantics = [#tpu.dimension_semantics<parallel>], iteration_bounds = array<i64: 1>, scalar_prefetch = 0 : i64, scratch_operands = 0 : i64, tpu.core_type = #tpu.core_type<tc>, window_params = [{transform_indices = @transform_0, window_bounds = array<i64: 4, 128>}, {pipeline_mode = #tpu.pipeline_mode<synchronous>, transform_indices = @transform_1, window_bounds = array<i64: 1, 128>}, {pipeline_mode = #tpu.pipeline_mode<synchronous>, transform_indices = @transform_2, window_bounds = array<i64: 1, 128>}, {transform_indices = @transform_3, window_bounds = array<i64: 4, 128>}]} {
    %c0 = arith.constant 0 : index
    %c0_0 = arith.constant 0 : index
    %0 = vector.load %arg1[%c0, %c0_0] : memref<4x128xf32, #tpu.memory_space<vmem>>, vector<4x128xf32>
    %c0_1 = arith.constant 0 : index
    %c0_2 = arith.constant 0 : index
    %1 = vector.load %arg2[%c0_1, %c0_2] : memref<1x128xf32, #tpu.memory_space<vmem>>, vector<1x128xf32>
    %c0_3 = arith.constant 0 : index
    %c0_4 = arith.constant 0 : index
    %2 = vector.load %arg3[%c0_3, %c0_4] : memref<1x128xf32, #tpu.memory_space<vmem>>, vector<1x128xf32>
    %3 = tpu.iota {dimensions = array<i32: 0>} : vector<128x4xi32>
    %4 = tpu.iota {dimensions = array<i32: 1>} : vector<128x4xi32>
    %c32_i32 = arith.constant 32 : i32
    %5 = vector.broadcast %c32_i32 : i32 to vector<128x4xi32>
    %6 = arith.muli %4, %5 : vector<128x4xi32>
    %7 = arith.cmpi sge, %3, %6 : vector<128x4xi32>
    %c1_i32 = arith.constant 1 : i32
    %8 = vector.broadcast %c1_i32 : i32 to vector<128x4xi32>
    %9 = arith.addi %4, %8 : vector<128x4xi32>
    %c32_i32_5 = arith.constant 32 : i32
    %10 = vector.broadcast %c32_i32_5 : i32 to vector<128x4xi32>
    %11 = arith.muli %9, %10 : vector<128x4xi32>
    %12 = arith.cmpi slt, %3, %11 : vector<128x4xi32>
    %13 = arith.andi %7, %12 : vector<128x4xi1>
    %14 = arith.extui %13 : vector<128x4xi1> to vector<128x4xi32>
    %15 = arith.sitofp %14 : vector<128x4xi32> to vector<128x4xf32>
    %16 = tpu.iota {dimensions = array<i32: 1>} : vector<4x128xi32>
    %17 = tpu.iota {dimensions = array<i32: 0>} : vector<4x128xi32>
    %c32_i32_6 = arith.constant 32 : i32
    %18 = vector.broadcast %c32_i32_6 : i32 to vector<4x128xi32>
    %19 = arith.muli %17, %18 : vector<4x128xi32>
    %20 = arith.cmpi sge, %16, %19 : vector<4x128xi32>
    %c1_i32_7 = arith.constant 1 : i32
    %21 = vector.broadcast %c1_i32_7 : i32 to vector<4x128xi32>
    %22 = arith.addi %17, %21 : vector<4x128xi32>
    %c32_i32_8 = arith.constant 32 : i32
    %23 = vector.broadcast %c32_i32_8 : i32 to vector<4x128xi32>
    %24 = arith.muli %22, %23 : vector<4x128xi32>
    %25 = arith.cmpi slt, %16, %24 : vector<4x128xi32>
    %26 = arith.andi %20, %25 : vector<4x128xi1>
    %27 = arith.extui %26 : vector<4x128xi1> to vector<4x128xi32>
    %28 = arith.sitofp %27 : vector<4x128xi32> to vector<4x128xf32>
    %cst = arith.constant dense<0.000000e+00> : vector<4x4xf32>
    %29 = tpu.matmul %0, %15, %cst {dimension_numbers = #tpu.dot_dimension_numbers<[1], [0], [0], [1], [0, 0, 1, 1], [], []>, precision = #tpu.contract_precision<fp32>} : vector<4x128xf32>, vector<128x4xf32>, vector<4x4xf32> -> vector<4x4xf32>
    %30 = arith.mulf %0, %0 : vector<4x128xf32>
    %cst_9 = arith.constant dense<0.000000e+00> : vector<4x4xf32>
    %31 = tpu.matmul %30, %15, %cst_9 {dimension_numbers = #tpu.dot_dimension_numbers<[1], [0], [0], [1], [0, 0, 1, 1], [], []>, precision = #tpu.contract_precision<fp32>} : vector<4x128xf32>, vector<128x4xf32>, vector<4x4xf32> -> vector<4x4xf32>
    %cst_10 = arith.constant 3.125000e-02 : f32
    %32 = vector.broadcast %cst_10 : f32 to vector<4x4xf32>
    %33 = arith.mulf %29, %32 : vector<4x4xf32>
    %34 = arith.mulf %33, %29 : vector<4x4xf32>
    %35 = arith.subf %31, %34 : vector<4x4xf32>
    %cst_11 = arith.constant 0.0322580636 : f32
    %36 = vector.broadcast %cst_11 : f32 to vector<4x4xf32>
    %37 = arith.mulf %35, %36 : vector<4x4xf32>
    %cst_12 = arith.constant 0.000000e+00 : f32
    %38 = vector.broadcast %cst_12 : f32 to vector<4x4xf32>
    %39 = arith.maximumf %37, %38 : vector<4x4xf32>
    %40 = math.sqrt %39 : vector<4x4xf32>
    %cst_13 = arith.constant 9.99999997E-7 : f32
    %41 = vector.broadcast %cst_13 : f32 to vector<4x4xf32>
    %42 = arith.addf %40, %41 : vector<4x4xf32>
    %cst_14 = arith.constant 1.000000e+00 : f32
    %43 = vector.broadcast %cst_14 : f32 to vector<4x4xf32>
    %44 = arith.divf %43, %42 : vector<4x4xf32>
    %cst_15 = arith.constant dense<0.000000e+00> : vector<4x128xf32>
    %45 = tpu.matmul %44, %28, %cst_15 {dimension_numbers = #tpu.dot_dimension_numbers<[1], [0], [0], [1], [0, 0, 1, 1], [], []>, precision = #tpu.contract_precision<fp32>} : vector<4x4xf32>, vector<4x128xf32>, vector<4x128xf32> -> vector<4x128xf32>
    %46 = arith.mulf %33, %44 : vector<4x4xf32>
    %cst_16 = arith.constant 0.000000e+00 : f32
    %47 = vector.broadcast %cst_16 : f32 to vector<4x4xf32>
    %48 = arith.subf %47, %46 : vector<4x4xf32>
    %cst_17 = arith.constant dense<0.000000e+00> : vector<4x128xf32>
    %49 = tpu.matmul %48, %28, %cst_17 {dimension_numbers = #tpu.dot_dimension_numbers<[1], [0], [0], [1], [0, 0, 1, 1], [], []>, precision = #tpu.contract_precision<fp32>} : vector<4x4xf32>, vector<4x128xf32>, vector<4x128xf32> -> vector<4x128xf32>
    %50 = arith.mulf %0, %45 : vector<4x128xf32>
    %51 = arith.addf %50, %49 : vector<4x128xf32>
    %52 = vector.broadcast %1 : vector<1x128xf32> to vector<4x128xf32>
    %53 = arith.mulf %52, %51 : vector<4x128xf32>
    %54 = vector.broadcast %2 : vector<1x128xf32> to vector<4x128xf32>
    %55 = arith.addf %53, %54 : vector<4x128xf32>
    %c0_18 = arith.constant 0 : index
    %c0_19 = arith.constant 0 : index
    %56 = vector.load %arg4[%c0_18, %c0_19] : memref<4x128xf32, #tpu.memory_space<vmem>>, vector<4x128xf32>
    tpu.vector_store %arg4[%c0_18, %c0_19], %55 {strides = array<i32>} : memref<4x128xf32, #tpu.memory_space<vmem>>, vector<4x128xf32>,
    return
  }
  func.func @transform_0(%arg0: i32) -> (i32, i32) {
    %c0_i32 = arith.constant 0 : i32
    %c0_i32_0 = arith.constant 0 : i32
    return %arg0, %c0_i32 : i32, i32
  }
  func.func @transform_1(%arg0: i32) -> (i32, i32) {
    %c0_i32 = arith.constant 0 : i32
    %c0_i32_0 = arith.constant 0 : i32
    %c0_i32_1 = arith.constant 0 : i32
    return %c0_i32, %c0_i32_0 : i32, i32
  }
  func.func @transform_2(%arg0: i32) -> (i32, i32) {
    %c0_i32 = arith.constant 0 : i32
    %c0_i32_0 = arith.constant 0 : i32
    %c0_i32_1 = arith.constant 0 : i32
    return %c0_i32, %c0_i32_0 : i32, i32
  }
  func.func @transform_3(%arg0: i32) -> (i32, i32) {
    %c0_i32 = arith.constant 0 : i32
    %c0_i32_0 = arith.constant 0 : i32
    return %arg0, %c0_i32 : i32, i32
  }
}

</mosaic_0001>

<bundles_post_ra>
// kernel: tpu_custom_call.1
= control target key start
LH: loop header
LB: loop body
LE: loop exit
PB: predicated region body
PF: predicated region fallthrough
CT: control target
= control target key end

     0   :  { %8 = vsyncpa [#allocation3], 0  ;;  %s4382_s0 = inlined_call_operand.hbm [shape: f32[4,128], index: 0, kind: input, shape index: {}]   ;;  %s4383_s1 = inlined_call_operand.vmem [shape: f32[1,128], index: 1, kind: input, shape index: {}]   ;;  %s4384_s2 = inlined_call_operand.vmem [shape: f32[1,128], index: 2, kind: input, shape index: {}]   ;;  %s4385_s3 = inlined_call_operand.hbm [shape: f32[4,128], index: 3, kind: output, shape index: {}]  }
   0x1   :  { %9 = vsyncpa [#allocation4], 0  ;;  %s3258_s12 = smov [#allocation2]  }
   0x2   :  { %s16_s13 = sshll.u32 %s3258_s12, 4  ;;  %s17_s13 = int_to_ptr.vmem [resolvable:$true] %s16_s13 }
   0x3   :  { %s3222_s14 = scalar_lea.vmem %s17_s13, 64  ;;  %p3227_p1 = scmp.lt.s32.totalorder %s17_s13, %s17_s13 }
   0x4   :  { %p3223_p0 = scmp.ne.s32.totalorder %s17_s13, %s3222_s14  ;;  %p3228_p2 = scmp.lt.s32.totalorder %s3222_s14, %s3222_s14 }
   0x6   :  { %p3229_p3 = por %p3228_p2, %p3227_p1 }
   0x8   :  { %p3230_p4 = pnand %p3229_p3, %p3223_p0 }
   0xa   :  { %3233 = shalt.err (!%p3230_p4)
}
   0xb   :  { %19 = dma.hbm_to_vmem [thread:$0]  %s4382_s0, 64, %s17_s13, [#allocation3]   ;;  %v30_v0 = vlaneseq }
   0xc   :  { %3254 = dma.done.wait [#allocation3], 64  }
   0xd   :  { %3255 = vsyncadd [#allocation3], 4294967232  ;;  %v3259_v1 = vmov 0.0   ;;  %v3288_v2 = vshrl.u32 %v30_v0, 7  ;;  %v3290_v3 = vand.u32 127, %v30_v0  ;;  %vm4386_vm0 = vmmov 0  }
   0xe   :  { %2724 = vmatprep.subr.mxu0 %v3259_v1  ;;  %2759 = vmatprep.subr.mxu1 %v3259_v1  ;;  %v4416_v14 = vmov 0  ;;  %v4396_v15 = vmov 1.0   ;;  %v4422_v26 = vmov 0  ;;  %v4426_v33 = vmov 0  ;;  %s3262_s20 = smov [#allocation5]  }
   0xf   :  { %4414 = vst [vmem:[#allocation8_spill] sm:$0xff] %v3288_v2  ;;  %4415 = vst [vmem:[#allocation9_spill] sm:$0xff] %v3290_v3  ;;  %2756 = vmatprep.mubr.msk.f32.mxu0 %vm4386_vm0, %v3259_v1  ;;  %2791 = vmatprep.mubr.msk.f32.mxu1 %vm4386_vm0, %v3259_v1  ;;  %v46_v4 = vadd.s32 120, %v3288_v2  ;;  %v3298_v5 = vmul.u32 32, %v3290_v3  ;;  %v66_v6 = vadd.s32 1, %v3290_v3  ;;  %v45_v7 = vadd.s32 112, %v3288_v2 }
  0x10   :  { %v44_v8 = vadd.s32 104, %v3288_v2  ;;  %v43_v9 = vadd.s32 96, %v3288_v2  ;;  %v42_v10 = vadd.s32 88, %v3288_v2  ;;  %v41_v11 = vadd.s32 80, %v3288_v2  ;;  %s2366_s21 = sshll.u32 %s3262_s20, 4  ;;  %s2367_s21 = int_to_ptr.vmem [resolvable:$true] %s2366_s21 }
  0x11   :  { %vm65_vm1 = vcmp.ge.s32.totalorder %v46_v4, %v3298_v5  ;;  %v3307_v12 = vmul.u32 32, %v66_v6  ;;  %vm64_vm2 = vcmp.ge.s32.totalorder %v45_v7, %v3298_v5  ;;  %v40_v13 = vadd.s32 72, %v3288_v2  ;;  %s3234_s22 = scalar_lea.vmem %s2367_s21, 64  ;;  %p3239_p6 = scmp.lt.s32.totalorder %s2367_s21, %s2367_s21 }
  0x12   :  { %vm63_vm3 = vcmp.ge.s32.totalorder %v44_v8, %v3298_v5  ;;  %vm62_vm4 = vcmp.ge.s32.totalorder %v43_v9, %v3298_v5  ;;  %vm61_vm5 = vcmp.ge.s32.totalorder %v42_v10, %v3298_v5  ;;  %vm60_vm6 = vcmp.ge.s32.totalorder %v41_v11, %v3298_v5  ;;  %p3235_p5 = scmp.ne.s32.totalorder %s2367_s21, %s3234_s22  ;;  %p3240_p7 = scmp.lt.s32.totalorder %s3234_s22, %s3234_s22 }
  0x13   :  { %vm83_vm7 = vcmp.lt.s32.totalorder %v46_v4, %v3307_v12  ;;  %vm82_vm8 = vcmp.lt.s32.totalorder %v45_v7, %v3307_v12  ;;  %vm81_vm9 = vcmp.lt.s32.totalorder %v44_v8, %v3307_v12  ;;  %vm80_vm10 = vcmp.lt.s32.totalorder %v43_v9, %v3307_v12 }
  0x14   :  { %vm3319_vm11 = vmand %vm65_vm1, %vm83_vm7  ;;  %vm79_vm12 = vcmp.lt.s32.totalorder %v42_v10, %v3307_v12  ;;  %vm78_vm13 = vcmp.lt.s32.totalorder %v41_v11, %v3307_v12  ;;  %vm59_vm14 = vcmp.ge.s32.totalorder %v40_v13, %v3298_v5  ;;  %vm77_vm15 = vcmp.lt.s32.totalorder %v40_v13, %v3307_v12  ;;  %p3241_p8 = por %p3240_p7, %p3239_p6 }
  0x15   :  { %v4417_v14 = vsel %vm3319_vm11, 4294967295, %v4416_v14  ;;  %2725 = vmatpush3.msk.msra.mxu0 %vm3319_vm11, %v4396_v15  ;;  %vm3332_vm0 = vmand %vm64_vm2, %vm82_vm8  ;;  %v2390_v17 = vsel %vm3319_vm11, 1.0, %v3259_v1  ;;  %v39_v18 = vadd.s32 64, %v3288_v2  ;;  %v38_v19 = vadd.s32 56, %v3288_v2 }
  0x16   :  { %v3342_v20 = vadd.s32 48, %v3288_v2  ;;  %2726 = vmatprep.subr.mxu0 %v3259_v1  ;;  %vm3349_vm1 = vmand %vm63_vm3, %vm81_vm9  ;;  %v3353_v22 = vsub.f32 %v2390_v17, %v2390_v17  ;;  %v2389_v23 = vsel %vm3332_vm0, 1.0, %v3259_v1  ;;  %v3359_v24 = vadd.s32 40, %v3288_v2  ;;  %p3242_p9 = pnand %p3241_p8, %p3235_p5 }
  0x17   :  { %v3362_v25 = vadd.s32 32, %v3288_v2  ;;  %2727 = vmatpush3.msk.msra.mxu0 %vm3332_vm0, %v4396_v15  ;;  %vm3371_vm2 = vmand %vm62_vm4, %vm80_vm10  ;;  %v3375_v27 = vsub.f32 %v2389_v23, %v2389_v23  ;;  %v2388_v28 = vsel %vm3349_vm1, 1.0, %v3259_v1  ;;  %vm58_vm3 = vcmp.ge.s32.totalorder %v39_v18, %v3298_v5 }
  0x18   :  { %v4423_v26 = vsel %vm3371_vm2, 4294967295, %v4422_v26  ;;  %vm76_vm7 = vcmp.lt.s32.totalorder %v39_v18, %v3307_v12  ;;  %2728 = vmatprep.subr.mxu0 %v3259_v1  ;;  %vm3387_vm4 = vmand %vm61_vm5, %vm79_vm12  ;;  %v3392_v30 = vand.u32 4294901760, %v3353_v22  ;;  %v3394_v31 = vsub.f32 %v2388_v28, %v2388_v28 }
  0x19   :  { %v2387_v32 = vsel %vm3371_vm2, 1.0, %v3259_v1  ;;  %vm57_vm8 = vcmp.ge.s32.totalorder %v38_v19, %v3298_v5  ;;  %2729 = vmatpush3.msk.msra.mxu0 %vm3349_vm1, %v4396_v15  ;;  %vm3407_vm5 = vmand %vm60_vm6, %vm78_vm13  ;;  %v3412_v34 = vand.u32 4294901760, %v3375_v27  ;;  %vm75_vm9 = vcmp.lt.s32.totalorder %v38_v19, %v3307_v12 }
  0x1a   :  { %v4427_v33 = vsel %vm3407_vm5, 4294967295, %v4426_v33  ;;  %v3414_v35 = vsub.f32 %v2387_v32, %v2387_v32  ;;  %v2386_v36 = vsel %vm3387_vm4, 1.0, %v3259_v1  ;;  %2730 = vmatprep.subr.mxu0 %v3259_v1  ;;  %v235_v37 = vsub.f32 %v3353_v22, %v3392_v30  ;;  %vm3439_vm10 = vmand %vm59_vm14, %vm77_vm15 }
  0x1b   :  { %v3424_v38 = vand.u32 4294901760, %v3394_v31  ;;  %v3426_v39 = vsub.f32 %v2386_v36, %v2386_v36  ;;  %vm56_vm6 = vcmp.ge.s32.totalorder %v3342_v20, %v3298_v5  ;;  %2731 = vmatpush3.msk.msra.mxu0 %vm3371_vm2, %v4396_v15  ;;  %v242_v40 = vsub.f32 %v3375_v27, %v3412_v34  ;;  %vm3470_vm13 = vmand %vm58_vm3, %vm76_vm7  ;;  %v3616_v36 = vld [vmem:[#allocation2] sm:$0xf] }
  0x1c   :  { %v3444_v42 = vand.u32 4294901760, %v3414_v35  ;;  %vm74_vm12 = vcmp.lt.s32.totalorder %v3342_v20, %v3307_v12  ;;  %v2385_v43 = vsel %vm3407_vm5, 1.0, %v3259_v1  ;;  %2732 = vmatprep.subr.mxu0 %v3259_v1  ;;  %v3452_v44 = vand.u32 4294901760, %v235_v37  ;;  %vm3488_vm3 = vmand %vm57_vm8, %vm75_vm9 }
  0x1d   :  { %v249_v45 = vsub.f32 %v3394_v31, %v3424_v38  ;;  %v3457_v46 = vand.u32 4294901760, %v3426_v39  ;;  %v3459_v47 = vsub.f32 %v2385_v43, %v2385_v43  ;;  %2733 = vmatpush3.msk.msra.mxu0 %vm3387_vm4, %v4396_v15  ;;  %v3464_v48 = vand.u32 4294901760, %v242_v40  ;;  %vm3522_vm9 = vmand %vm56_vm6, %vm74_vm12 }
  0x1e   :  { %v4430_v49 = vmov 0  ;;  %v256_v50 = vsub.f32 %v3414_v35, %v3444_v42  ;;  %vm55_vm14 = vcmp.ge.s32.totalorder %v3359_v24, %v3298_v5  ;;  %vm73_vm15 = vcmp.lt.s32.totalorder %v3359_v24, %v3307_v12  ;;  %2734 = vmatprep.subr.mxu0 %v3259_v1  ;;  %2760 = vmatpush3.msra.mxu1 %v3452_v44 }
  0x1f   :  { %v4431_v49 = vsel %vm3470_vm13, 4294967295, %v4430_v49  ;;  %v3482_v51 = vand.u32 4294901760, %v249_v45  ;;  %v4432_v52 = vmov 0  ;;  %v263_v53 = vsub.f32 %v3426_v39, %v3457_v46  ;;  %2735 = vmatpush3.msk.msra.mxu0 %vm3407_vm5, %v4396_v15  ;;  %2761 = vmatprep.subr.mxu1 %v3259_v1  ;;  %vm3542_vm6 = vmand %vm55_vm14, %vm73_vm15 }
  0x20   :  { %v4433_v52 = vsel %vm3488_vm3, 4294967295, %v4432_v52  ;;  %v3495_v54 = vand.u32 4294901760, %v3459_v47  ;;  %v2384_v55 = vsel %vm3439_vm10, 1.0, %v3259_v1  ;;  %v3504_v56 = vand.u32 4294901760, %v256_v50  ;;  %2736 = vmatprep.subr.mxu0 %v3259_v1  ;;  %2762 = vmatpush3.msra.mxu1 %v3464_v48 }
  0x21   :  { %v3506_v57 = vsub.f32 %v2384_v55, %v2384_v55  ;;  %vm54_vm7 = vcmp.ge.s32.totalorder %v3362_v25, %v3298_v5  ;;  %vm72_vm8 = vcmp.lt.s32.totalorder %v3362_v25, %v3307_v12  ;;  %v3514_v58 = vand.u32 4294901760, %v263_v53  ;;  %2737 = vmatpush3.msk.msra.mxu0 %vm3439_vm10, %v4396_v15  ;;  %2763 = vmatprep.subr.mxu1 %v3259_v1 }
  0x22   :  { %4434 = vst [vmem:[#allocation10_spill] sm:$0xff] %v3504_v56  ;;  %v4436_v59 = vmov 0  ;;  %v270_v60 = vsub.f32 %v3459_v47, %v3495_v54  ;;  %v2383_v61 = vsel %vm3470_vm13, 1.0, %v3259_v1  ;;  %v34_v62 = vadd.s32 24, %v3288_v2  ;;  %2738 = vmatprep.subr.mxu0 %v3259_v1  ;;  %2764 = vmatpush3.msra.mxu1 %v3482_v51  ;;  %vm3575_vm15 = vmand %vm54_vm7, %vm72_vm8 }
  0x23   :  { %4435 = vst [vmem:[#allocation11_spill] sm:$0xff] %v3514_v58  ;;  %v4437_v59 = vsel %vm3522_vm9, 4294967295, %v4436_v59  ;;  %v3547_v0 = vand.u32 4294901760, %v3506_v57  ;;  %v3549_v4 = vsub.f32 %v2383_v61, %v2383_v61  ;;  %v2382_v6 = vsel %vm3488_vm3, 1.0, %v3259_v1  ;;  %2739 = vmatpush3.msk.msra.mxu0 %vm3470_vm13, %v4396_v15  ;;  %2765 = vmatprep.subr.mxu1 %v3259_v1 }
  0x24   :  { %v33_v7 = vadd.s32 16, %v3288_v2  ;;  %v3557_v8 = vand.u32 4294901760, %v270_v60  ;;  %v3561_v9 = vsub.f32 %v2382_v6, %v2382_v6  ;;  %2740 = vmatprep.subr.mxu0 %v3259_v1  ;;  %2766 = vmatpush3.msra.mxu1 %v3504_v56  ;;  %v2381_v18 = vsel %vm3522_vm9, 1.0, %v3259_v1 }
  0x25   :  { %v277_v10 = vsub.f32 %v3506_v57, %v3547_v0  ;;  %v3580_v13 = vand.u32 4294901760, %v3549_v4  ;;  %v32_v19 = vadd.s32 8, %v3288_v2  ;;  %v2380_v20 = vsel %vm3542_vm6, 1.0, %v3259_v1  ;;  %2741 = vmatpush3.msk.msra.mxu0 %vm3488_vm3, %v4396_v15  ;;  %2767 = vmatprep.subr.mxu1 %v3259_v1 }
  0x26   :  { %4440 = vst [vmem:[#allocation12_spill] sm:$0xff] %v3557_v8  ;;  %vm70_vm14 = vcmp.lt.s32.totalorder %v33_v7, %v3307_v12  ;;  %v3587_v17 = vand.u32 4294901760, %v3561_v9  ;;  %vm4444_vm7 = vcmp.lt.s32.totalorder %v34_v62, %v3307_v12  ;;  %vm4445_vm8 = vcmp.ge.s32.totalorder %v34_v62, %v3298_v5  ;;  %2742 = vmatprep.subr.mxu0 %v3259_v1 }
  0x27   :  { %v3600_v23 = vand.u32 4294901760, %v277_v10  ;;  %v284_v24 = vsub.f32 %v3549_v4, %v3580_v13  ;;  %vm3608_vm12 = vmand %vm4445_vm8, %vm4444_vm7  ;;  %v3612_v28 = vsub.f32 %v2381_v18, %v2381_v18  ;;  %v3614_v32 = vsub.f32 %v2380_v20, %v2380_v20  ;;  %2768 = vmatpush3.msra.mxu1 %v3514_v58  ;;  %2743 = vmatpush3.msk.msra.mxu0 %vm3522_vm9, %v4396_v15 }
  0x28   :  { %v291_v37 = vsub.f32 %v3561_v9, %v3587_v17  ;;  %vm4448_vm7 = vcmp.ge.s32.totalorder %v33_v7, %v3298_v5  ;;  %vm51_vm3 = vcmp.ge.s32.totalorder %v32_v19, %v3298_v5  ;;  %vm69_vm13 = vcmp.lt.s32.totalorder %v32_v19, %v3307_v12  ;;  %2769 = vmatprep.subr.mxu1 %v3259_v1 }
  0x29   :  { %4443 = vst [vmem:[#allocation13_spill] sm:$0xff] %v3600_v23  ;;  %vm3626_vm8 = vmand %vm4448_vm7, %vm70_vm14  ;;  %v2379_v43 = vsel %vm3575_vm15, 1.0, %v3259_v1  ;;  %v3639_v45 = vand.u32 4294901760, %v284_v24  ;;  %v3642_v50 = vand.u32 4294901760, %v3612_v28  ;;  %v3645_v53 = vand.u32 4294901760, %v3614_v32  ;;  %2744 = vmatprep.subr.mxu0 %v3259_v1  ;;  %2770 = vmatpush3.msra.mxu1 %v3557_v8 }
  0x2a   :  { %vm50_vm14 = vcmp.ge.s32.totalorder %v3288_v2, %v3298_v5  ;;  %v3651_v55 = vand.u32 4294901760, %v291_v37  ;;  %vm3653_vm7 = vmand %vm51_vm3, %vm69_vm13  ;;  %v4453_v60 = vmov 0  ;;  %vm68_vm9 = vcmp.lt.s32.totalorder %v3288_v2, %v3307_v12  ;;  %2745 = vmatpush3.msk.msra.mxu0 %vm3542_vm6, %v4396_v15  ;;  %2771 = vmatprep.subr.mxu1 %v3259_v1 }
  0x2b   :  { %4451 = vst [vmem:[#allocation14_spill] sm:$0xff] %v3639_v45  ;;  %v4454_v60 = vsel %vm3653_vm7, 4294967295, %v4453_v60  ;;  %v3659_v61 = vsub.f32 %v2379_v43, %v2379_v43  ;;  %v3662_v62 = vand.u32 4294901760, %v3616_v36  ;;  %v298_v5 = vsub.f32 %v3612_v28, %v3642_v50  ;;  %vm3672_vm13 = vmand %vm50_vm14, %vm68_vm9  ;;  %2746 = vmatprep.subr.mxu0 %v3259_v1  ;;  %2772 = vmatpush3.msra.mxu1 %v3600_v23 }
  0x2c   :  { %4452 = vst [vmem:[#allocation15_spill] sm:$0xff] %v3651_v55  ;;  %v305_v6 = vsub.f32 %v3614_v32, %v3645_v53  ;;  %v2378_v12 = vsel %vm3608_vm12, 1.0, %v3259_v1  ;;  %v2377_v10 = vsel %vm3626_vm8, 1.0, %v3259_v1  ;;  %2747 = vmatpush3.msk.msra.mxu0 %vm3575_vm15, %v4396_v15  ;;  %2773 = vmatprep.subr.mxu1 %v3259_v1  ;;  %v2376_v43 = vsel %vm3653_vm7, 1.0, %v3259_v1 }
  0x2d   :  { %v3685_v18 = vand.u32 4294901760, %v3659_v61  ;;  %v3689_v19 = vsub.f32 %v3616_v36, %v3662_v62  ;;  %v3691_v20 = vsub.f32 %v2378_v12, %v2378_v12  ;;  %v3693_v24 = vsub.f32 %v2377_v10, %v2377_v10  ;;  %2748 = vmatprep.subr.mxu0 %v3259_v1  ;;  %2774 = vmatpush3.msra.mxu1 %v3639_v45 }
  0x2e   :  { %v3699_v37 = vand.u32 4294901760, %v298_v5  ;;  %v2375_v3 = vsel %vm3672_vm13, 1.0, %v3259_v1  ;;  %v4458_v2 = vmov 1.0   ;;  %2775 = vmatprep.subr.mxu1 %v3259_v1  ;;  %v3722_v23 = vsub.f32 %v2376_v43, %v2376_v43 }
  0x2f   :  { %v312_v12 = vsub.f32 %v3659_v61, %v3685_v18  ;;  %v3713_v5 = vand.u32 4294901760, %v3691_v20  ;;  %v3716_v15 = vand.u32 4294901760, %v3693_v24  ;;  %2749 = vmatpush3.msk.msra.mxu0 %vm3608_vm12, %v4458_v2  ;;  %v3724_v45 = vsub.f32 %v2375_v3, %v2375_v3  ;;  %2776 = vmatpush3.msra.mxu1 %v3651_v55 }
  0x30   :  { %4457 = vst [vmem:[#allocation16_spill] sm:$0xff] %v3699_v37  ;;  %2750 = vmatprep.subr.mxu0 %v3259_v1  ;;  %v3728_v10 = vand.u32 4294901760, %v305_v6  ;;  %v4460_v8 = vand.u32 4294901760, %v3689_v19  ;;  %2777 = vmatprep.subr.mxu1 %v3259_v1  ;;  %v3740_v3 = vand.u32 4294901760, %v3722_v23  ;;  %vm4461_vm3 = vnez %v4431_v49 }
  0x31   :  { %v319_v56 = vsub.f32 %v3691_v20, %v3713_v5  ;;  %2751 = vmatpush3.msk.msra.mxu0 %vm3626_vm8, %v4458_v2  ;;  %2778 = vmatpush3.msra.mxu1 %v3699_v37  ;;  %v3744_v6 = vand.u32 4294901760, %v312_v12  ;;  %v3749_v43 = vand.u32 4294901760, %v3724_v45  ;;  %vm4462_vm9 = vnez %v4433_v52 }
  0x32   :  { %4459 = vst [vmem:[#allocation17_spill] sm:$0xff] %v3728_v10  ;;  %v224_v58 = vsub.f32 %v3689_v19, %v4460_v8  ;;  %2752 = vmatprep.subr.mxu0 %v3259_v1  ;;  %v326_v8 = vsub.f32 %v3693_v24, %v3716_v15  ;;  %2779 = vmatprep.subr.mxu1 %v3259_v1  ;;  %vm4463_vm14 = vnez %v4437_v59 }
  0x33   :  { %2753 = vmatpush3.msk.msra.mxu0 %vm3653_vm7, %v4458_v2  ;;  %2780 = vmatpush3.msra.mxu1 %v3728_v10  ;;  %v3757_v37 = vand.u32 4294901760, %v319_v56  ;;  %v333_v12 = vsub.f32 %v3722_v23, %v3740_v3  ;;  %v340_v10 = vsub.f32 %v3724_v45, %v3749_v43 }
  0x34   :  { %v225_v55 = vand.u32 4294901760, %v224_v58  ;;  %2754 = vmatprep.subr.mxu0 %v3259_v1  ;;  %2781 = vmatprep.subr.mxu1 %v3259_v1  ;;  %v3767_v58 = vand.u32 4294901760, %v326_v8 }
  0x35   :  { %2755 = vmatpush3.msk.msra.mxu0 %vm3672_vm13, %v4458_v2  ;;  %2782 = vmatpush3.msra.mxu1 %v3744_v6  ;;  %v3774_v56 = vand.u32 4294901760, %v333_v12  ;;  %v3780_v8 = vand.u32 4294901760, %v340_v10  ;;  %v4471_v12 = vld [vmem:[#allocation13_spill] sm:$0xff] }
  0x36   :  { %2794 = vmatprep.subr.mxu0 %v3259_v1  ;;  %2757 = vmatmul.mubr.f32.vlgmr.msra.gmra.mxu0 %v225_v55  ;;  %v4465_v55 = vand.u32 4294901760, %v3689_v19 }
  0x37   :  { %2783 = vmatprep.subr.mxu1 %v3259_v1  ;;  %2795 = vmatpush3.msra.mxu0 %v3353_v22 }
  0x38   :  { %2784 = vmatpush3.msra.mxu1 %v3757_v37  ;;  %2796 = vmatprep.subr.mxu0 %v3259_v1 }
  0x39   :  { %2785 = vmatprep.subr.mxu1 %v3259_v1  ;;  %2797 = vmatpush3.msra.mxu0 %v3375_v27 }
  0x3a   :  { %2786 = vmatpush3.msra.mxu1 %v3767_v58  ;;  %2798 = vmatprep.subr.mxu0 %v3259_v1 }
  0x3b   :  { %2787 = vmatprep.subr.mxu1 %v3259_v1  ;;  %2799 = vmatpush3.msra.mxu0 %v3394_v31 }
  0x3c   :  { %2788 = vmatpush3.msra.mxu1 %v3774_v56  ;;  %2800 = vmatprep.subr.mxu0 %v3259_v1 }
  0x3d   :  { %2789 = vmatprep.subr.mxu1 %v3259_v1  ;;  %2801 = vmatpush3.msra.mxu0 %v3414_v35 }
  0x3e   :  { %2790 = vmatpush3.msra.mxu1 %v3780_v8  ;;  %2802 = vmatprep.subr.mxu0 %v3259_v1 }
  0x3f   :  { %2792 = vmatmul.mubr.f32.vlgmr.msra.gmra.mxu1 %v3662_v62  ;;  %2803 = vmatpush3.msra.mxu0 %v3426_v39 }
  0x40   :  { %2829 = vmatprep.subr.mxu1 %v3259_v1  ;;  %2804 = vmatprep.subr.mxu0 %v3259_v1 }
  0x41   :  { %2830 = vmatpush3.msk.msra.mxu1 %vm3319_vm11, %v4458_v2  ;;  %2805 = vmatpush3.msra.mxu0 %v3459_v47 }
  0x42   :  { %2831 = vmatprep.subr.mxu1 %v3259_v1  ;;  %2806 = vmatprep.subr.mxu0 %v3259_v1 }
  0x43   :  { %2832 = vmatpush3.msk.msra.mxu1 %vm3332_vm0, %v4458_v2  ;;  %2807 = vmatpush3.msra.mxu0 %v3506_v57 }
  0x44   :  { %2833 = vmatprep.subr.mxu1 %v3259_v1  ;;  %2808 = vmatprep.subr.mxu0 %v3259_v1 }
  0x45   :  { %2834 = vmatpush3.msk.msra.mxu1 %vm3349_vm1, %v4458_v2  ;;  %2809 = vmatpush3.msra.mxu0 %v3549_v4 }
  0x46   :  { %2835 = vmatprep.subr.mxu1 %v3259_v1  ;;  %2810 = vmatprep.subr.mxu0 %v3259_v1 }
  0x47   :  { %2836 = vmatpush3.msk.msra.mxu1 %vm3371_vm2, %v4458_v2  ;;  %2811 = vmatpush3.msra.mxu0 %v3561_v9 }
  0x48   :  { %2837 = vmatprep.subr.mxu1 %v3259_v1  ;;  %2812 = vmatprep.subr.mxu0 %v3259_v1 }
  0x49   :  { %2838 = vmatpush3.msk.msra.mxu1 %vm3387_vm4, %v4458_v2  ;;  %2813 = vmatpush3.msra.mxu0 %v3612_v28 }
  0x4a   :  { %2839 = vmatprep.subr.mxu1 %v3259_v1  ;;  %2814 = vmatprep.subr.mxu0 %v3259_v1 }
  0x4b   :  { %2840 = vmatpush3.msk.msra.mxu1 %vm3407_vm5, %v4458_v2  ;;  %2815 = vmatpush3.msra.mxu0 %v3614_v32 }
  0x4c   :  { %2841 = vmatprep.subr.mxu1 %v3259_v1  ;;  %2816 = vmatprep.subr.mxu0 %v3259_v1 }
  0x4d   :  { %2842 = vmatpush3.msk.msra.mxu1 %vm3439_vm10, %v4458_v2  ;;  %2817 = vmatpush3.msra.mxu0 %v3659_v61 }
  0x4e   :  { %2843 = vmatprep.subr.mxu1 %v3259_v1  ;;  %2818 = vmatprep.subr.mxu0 %v3259_v1 }
  0x4f   :  { %2844 = vmatpush3.msk.msra.mxu1 %vm4461_vm3, %v4458_v2  ;;  %2819 = vmatpush3.msra.mxu0 %v3691_v20 }
  0x50   :  { %2845 = vmatprep.subr.mxu1 %v3259_v1  ;;  %2820 = vmatprep.subr.mxu0 %v3259_v1 }
  0x51   :  { %2846 = vmatpush3.msk.msra.mxu1 %vm4462_vm9, %v4458_v2  ;;  %2821 = vmatpush3.msra.mxu0 %v3693_v24  ;;  %vm4464_vm9 = vmmov 0  }
  0x52   :  { %2847 = vmatprep.subr.mxu1 %v3259_v1  ;;  %2822 = vmatprep.subr.mxu0 %v3259_v1 }
  0x53   :  { %2848 = vmatpush3.msk.msra.mxu1 %vm4463_vm14, %v4458_v2  ;;  %2823 = vmatpush3.msra.mxu0 %v3722_v23 }
  0x54   :  { %2849 = vmatprep.subr.mxu1 %v3259_v1  ;;  %2824 = vmatprep.subr.mxu0 %v3259_v1 }
  0x55   :  { %2850 = vmatpush3.msk.msra.mxu1 %vm3542_vm6, %v4458_v2  ;;  %2825 = vmatpush3.msra.mxu0 %v3724_v45 }
  0x56   :  { %2826 = vmatprep.mubr.msk.f32.mxu0 %vm4464_vm9, %v3259_v1  ;;  %2851 = vmatprep.subr.mxu1 %v3259_v1 }
  0x57   :  { %2827 = vmatmul.mubr.f32.vlgmr.msra.gmra.mxu0 %v3689_v19  ;;  %2852 = vmatpush3.msk.msra.mxu1 %vm3575_vm15, %v4458_v2  ;;  %v781_v19 = vmul.f32 %v3616_v36, %v3616_v36 }
  0x58   :  { %2864 = vmatprep.subr.mxu0 %v3259_v1  ;;  %2853 = vmatprep.subr.mxu1 %v3259_v1 }
  0x59   :  { %2865 = vmatpush3.msra.mxu0 %v3392_v30  ;;  %2854 = vmatpush3.msk.msra.mxu1 %vm3608_vm12, %v4458_v2  ;;  %v4023_v36 = vand.u32 4294901760, %v781_v19 }
  0x5a   :  { %2866 = vmatprep.subr.mxu0 %v3259_v1  ;;  %2855 = vmatprep.subr.mxu1 %v3259_v1 }
  0x5b   :  { %2867 = vmatpush3.msra.mxu0 %v3412_v34  ;;  %2856 = vmatpush3.msk.msra.mxu1 %vm3626_vm8, %v4458_v2 }
  0x5c   :  { %2868 = vmatprep.subr.mxu0 %v3259_v1  ;;  %2857 = vmatprep.subr.mxu1 %v3259_v1 }
  0x5d   :  { %2869 = vmatpush3.msra.mxu0 %v3424_v38  ;;  %2858 = vmatpush3.msk.msra.mxu1 %vm3653_vm7, %v4458_v2 }
  0x5e   :  { %2870 = vmatprep.subr.mxu0 %v3259_v1  ;;  %2859 = vmatprep.subr.mxu1 %v3259_v1 }
  0x5f   :  { %2871 = vmatpush3.msra.mxu0 %v3444_v42  ;;  %2860 = vmatpush3.msk.msra.mxu1 %vm3672_vm13, %v4458_v2 }
  0x60   :  { %2861 = vmatprep.mubr.msk.f32.mxu1 %vm4464_vm9, %v3259_v1  ;;  %2872 = vmatprep.subr.mxu0 %v3259_v1 }
  0x61   :  { %2862 = vmatmul.mubr.f32.vlgmr.msra.gmra.mxu1 %v4465_v55  ;;  %2873 = vmatpush3.msra.mxu0 %v3457_v46  ;;  %v4472_v55 = vld [vmem:[#allocation14_spill] sm:$0xff] }
  0x62   :  { %2899 = vmatprep.subr.mxu1 %v3259_v1  ;;  %2874 = vmatprep.subr.mxu0 %v3259_v1 }
  0x63   :  { %2900 = vmatpush3.msk.msra.mxu1 %vm3319_vm11, %v4458_v2  ;;  %2875 = vmatpush3.msra.mxu0 %v3495_v54 }
  0x64   :  { %2901 = vmatprep.subr.mxu1 %v3259_v1  ;;  %2876 = vmatprep.subr.mxu0 %v3259_v1 }
  0x65   :  { %2902 = vmatpush3.msk.msra.mxu1 %vm3332_vm0, %v4458_v2  ;;  %2877 = vmatpush3.msra.mxu0 %v3547_v0 }
  0x66   :  { %2903 = vmatprep.subr.mxu1 %v3259_v1  ;;  %2878 = vmatprep.subr.mxu0 %v3259_v1 }
  0x67   :  { %2904 = vmatpush3.msk.msra.mxu1 %vm3349_vm1, %v4458_v2  ;;  %2879 = vmatpush3.msra.mxu0 %v3580_v13 }
  0x68   :  { %2905 = vmatprep.subr.mxu1 %v3259_v1  ;;  %2880 = vmatprep.subr.mxu0 %v3259_v1 }
  0x69   :  { %2906 = vmatpush3.msk.msra.mxu1 %vm3371_vm2, %v4458_v2  ;;  %2881 = vmatpush3.msra.mxu0 %v3587_v17 }
  0x6a   :  { %2907 = vmatprep.subr.mxu1 %v3259_v1  ;;  %2882 = vmatprep.subr.mxu0 %v3259_v1 }
  0x6b   :  { %2908 = vmatpush3.msk.msra.mxu1 %vm3387_vm4, %v4458_v2  ;;  %2883 = vmatpush3.msra.mxu0 %v3642_v50 }
  0x6c   :  { %2909 = vmatprep.subr.mxu1 %v3259_v1  ;;  %2884 = vmatprep.subr.mxu0 %v3259_v1 }
  0x6d   :  { %2910 = vmatpush3.msk.msra.mxu1 %vm3407_vm5, %v4458_v2  ;;  %2885 = vmatpush3.msra.mxu0 %v3645_v53  ;;  %vm4466_vm5 = vnez %v4433_v52 }
  0x6e   :  { %2911 = vmatprep.subr.mxu1 %v3259_v1  ;;  %2886 = vmatprep.subr.mxu0 %v3259_v1 }
  0x6f   :  { %2912 = vmatpush3.msk.msra.mxu1 %vm3439_vm10, %v4458_v2  ;;  %2887 = vmatpush3.msra.mxu0 %v3685_v18 }
  0x70   :  { %2913 = vmatprep.subr.mxu1 %v3259_v1  ;;  %2888 = vmatprep.subr.mxu0 %v3259_v1 }
  0x71   :  { %2914 = vmatpush3.msk.msra.mxu1 %vm4461_vm3, %v4458_v2  ;;  %2889 = vmatpush3.msra.mxu0 %v3713_v5 }
  0x72   :  { %2915 = vmatprep.subr.mxu1 %v3259_v1  ;;  %2890 = vmatprep.subr.mxu0 %v3259_v1 }
  0x73   :  { %2916 = vmatpush3.msk.msra.mxu1 %vm4466_vm5, %v4458_v2  ;;  %2891 = vmatpush3.msra.mxu0 %v3716_v15 }
  0x74   :  { %2917 = vmatprep.subr.mxu1 %v3259_v1  ;;  %2892 = vmatprep.subr.mxu0 %v3259_v1 }
  0x75   :  { %2918 = vmatpush3.msk.msra.mxu1 %vm4463_vm14, %v4458_v2  ;;  %2893 = vmatpush3.msra.mxu0 %v3740_v3 }
  0x76   :  { %2919 = vmatprep.subr.mxu1 %v3259_v1  ;;  %2894 = vmatprep.subr.mxu0 %v3259_v1 }
  0x77   :  { %2920 = vmatpush3.msk.msra.mxu1 %vm3542_vm6, %v4458_v2  ;;  %2895 = vmatpush3.msra.mxu0 %v3749_v43 }
  0x78   :  { %2896 = vmatprep.mubr.msk.f32.mxu0 %vm4464_vm9, %v3259_v1  ;;  %2921 = vmatprep.subr.mxu1 %v3259_v1 }
  0x79   :  { %2897 = vmatmul.mubr.f32.vlgmr.msra.gmra.mxu0 %v3662_v62  ;;  %2922 = vmatpush3.msk.msra.mxu1 %vm3575_vm15, %v4458_v2 }
  0x7a   :  { %2934 = vmatprep.subr.mxu0 %v3259_v1  ;;  %2923 = vmatprep.subr.mxu1 %v3259_v1 }
  0x7b   :  { %2935 = vmatpush3.msk.msra.mxu0 %vm3319_vm11, %v4458_v2  ;;  %2924 = vmatpush3.msk.msra.mxu1 %vm3608_vm12, %v4458_v2 }
  0x7c   :  { %2936 = vmatprep.subr.mxu0 %v3259_v1  ;;  %2925 = vmatprep.subr.mxu1 %v3259_v1 }
  0x7d   :  { %2937 = vmatpush3.msk.msra.mxu0 %vm3332_vm0, %v4458_v2  ;;  %2926 = vmatpush3.msk.msra.mxu1 %vm3626_vm8, %v4458_v2 }
  0x7e   :  { %2938 = vmatprep.subr.mxu0 %v3259_v1  ;;  %2927 = vmatprep.subr.mxu1 %v3259_v1 }
  0x7f   :  { %2939 = vmatpush3.msk.msra.mxu0 %vm3349_vm1, %v4458_v2  ;;  %2928 = vmatpush3.msk.msra.mxu1 %vm3653_vm7, %v4458_v2 }
  0x80   :  { %2940 = vmatprep.subr.mxu0 %v3259_v1  ;;  %2929 = vmatprep.subr.mxu1 %v3259_v1 }
  0x81   :  { %2941 = vmatpush3.msk.msra.mxu0 %vm3371_vm2, %v4458_v2  ;;  %2930 = vmatpush3.msk.msra.mxu1 %vm3672_vm13, %v4458_v2  ;;  %vm4467_vm2 = vnez %v4427_v33 }
  0x82   :  { %2931 = vmatprep.mubr.msk.f32.mxu1 %vm4464_vm9, %v3259_v1  ;;  %2942 = vmatprep.subr.mxu0 %v3259_v1 }
  0x83   :  { %2932 = vmatmul.mubr.f32.vlgmr.msra.gmra.mxu1 %v3662_v62  ;;  %2943 = vmatpush3.msk.msra.mxu0 %vm3387_vm4, %v4458_v2  ;;  %v4470_v62 = vld [vmem:[#allocation12_spill] sm:$0xff] }
  0x84   :  { %2969 = vmatprep.subr.mxu1 %v3259_v1  ;;  %2944 = vmatprep.subr.mxu0 %v3259_v1 }
  0x85   :  { %2970 = vmatpush3.msra.mxu1 %v3452_v44  ;;  %2945 = vmatpush3.msk.msra.mxu0 %vm4467_vm2, %v4458_v2  ;;  %v4468_v44 = vld [vmem:[#allocation10_spill] sm:$0xff] }
  0x86   :  { %2971 = vmatprep.subr.mxu1 %v3259_v1  ;;  %2946 = vmatprep.subr.mxu0 %v3259_v1 }
  0x87   :  { %2972 = vmatpush3.msra.mxu1 %v3464_v48  ;;  %2947 = vmatpush3.msk.msra.mxu0 %vm3439_vm10, %v4458_v2  ;;  %v4038_v48 = vsub.f32 %v781_v19, %v4023_v36 }
  0x88   :  { %2973 = vmatprep.subr.mxu1 %v3259_v1  ;;  %2948 = vmatprep.subr.mxu0 %v3259_v1 }
  0x89   :  { %2974 = vmatpush3.msra.mxu1 %v3482_v51  ;;  %2949 = vmatpush3.msk.msra.mxu0 %vm4461_vm3, %v4458_v2  ;;  %v4469_v51 = vld [vmem:[#allocation11_spill] sm:$0xff]  ;;  %v865_v10 = vand.u32 4294901760, %v4038_v48 }
  0x8a   :  { %2975 = vmatprep.subr.mxu1 %v3259_v1  ;;  %2950 = vmatprep.subr.mxu0 %v3259_v1 }
  0x8b   :  { %2976 = vmatpush3.msra.mxu1 %v4468_v44  ;;  %2951 = vmatpush3.msk.msra.mxu0 %vm4466_vm5, %v4458_v2  ;;  %v866_v19 = vsub.f32 %v4038_v48, %v865_v10  ;;  %v4473_v44 = vld [vmem:[#allocation15_spill] sm:$0xff] }
  0x8c   :  { %2977 = vmatprep.subr.mxu1 %v3259_v1  ;;  %2952 = vmatprep.subr.mxu0 %v3259_v1 }
  0x8d   :  { %2978 = vmatpush3.msra.mxu1 %v4469_v51  ;;  %2953 = vmatpush3.msk.msra.mxu0 %vm4463_vm14, %v4458_v2  ;;  %v4474_v51 = vld [vmem:[#allocation16_spill] sm:$0xff] }
  0x8e   :  { %2979 = vmatprep.subr.mxu1 %v3259_v1  ;;  %2954 = vmatprep.subr.mxu0 %v3259_v1 }
  0x8f   :  { %2980 = vmatpush3.msra.mxu1 %v4470_v62  ;;  %2955 = vmatpush3.msk.msra.mxu0 %vm3542_vm6, %v4458_v2  ;;  %v867_v62 = vand.u32 4294901760, %v866_v19 }
  0x90   :  { %2981 = vmatprep.subr.mxu1 %v3259_v1  ;;  %2956 = vmatprep.subr.mxu0 %v3259_v1 }
  0x91   :  { %2982 = vmatpush3.msra.mxu1 %v4471_v12  ;;  %2957 = vmatpush3.msk.msra.mxu0 %vm3575_vm15, %v4458_v2  ;;  %v4475_v12 = vld [vmem:[#allocation17_spill] sm:$0xff] }
  0x92   :  { %2983 = vmatprep.subr.mxu1 %v3259_v1  ;;  %2958 = vmatprep.subr.mxu0 %v3259_v1 }
  0x93   :  { %2984 = vmatpush3.msra.mxu1 %v4472_v55  ;;  %2959 = vmatpush3.msk.msra.mxu0 %vm3608_vm12, %v4458_v2 }
  0x94   :  { %2985 = vmatprep.subr.mxu1 %v3259_v1  ;;  %2960 = vmatprep.subr.mxu0 %v3259_v1 }
  0x95   :  { %2986 = vmatpush3.msra.mxu1 %v4473_v44  ;;  %2961 = vmatpush3.msk.msra.mxu0 %vm3626_vm8, %v4458_v2 }
  0x96   :  { %2987 = vmatprep.subr.mxu1 %v3259_v1  ;;  %2962 = vmatprep.subr.mxu0 %v3259_v1 }
  0x97   :  { %2988 = vmatpush3.msra.mxu1 %v4474_v51  ;;  %2963 = vmatpush3.msk.msra.mxu0 %vm3653_vm7, %v4458_v2 }
  0x98   :  { %2989 = vmatprep.subr.mxu1 %v3259_v1  ;;  %2964 = vmatprep.subr.mxu0 %v3259_v1 }
  0x99   :  { %2990 = vmatpush3.msra.mxu1 %v4475_v12  ;;  %2965 = vmatpush3.msk.msra.mxu0 %vm3672_vm13, %v4458_v2 }
  0x9a   :  { %2991 = vmatprep.subr.mxu1 %v3259_v1  ;;  %2966 = vmatprep.mubr.msk.f32.mxu0 %vm4464_vm9, %v3259_v1 }
  0x9b   :  { %2992 = vmatpush3.msra.mxu1 %v3744_v6  ;;  %3004 = vmatprep.subr.mxu0 %v3259_v1 }
  0x9c   :  { %2967 = vmatmul.mubr.f32.vlgmr.msra.gmra.mxu0 %v867_v62  ;;  %2993 = vmatprep.subr.mxu1 %v3259_v1 }
  0x9d   :  { %3005 = vmatpush3.msra.mxu0 %v3353_v22  ;;  %2994 = vmatpush3.msra.mxu1 %v3757_v37 }
  0x9e   :  { %3006 = vmatprep.subr.mxu0 %v3259_v1  ;;  %2995 = vmatprep.subr.mxu1 %v3259_v1 }
  0x9f   :  { %3007 = vmatpush3.msra.mxu0 %v3375_v27  ;;  %2996 = vmatpush3.msra.mxu1 %v3767_v58 }
  0xa0   :  { %3008 = vmatprep.subr.mxu0 %v3259_v1  ;;  %2997 = vmatprep.subr.mxu1 %v3259_v1 }
  0xa1   :  { %3009 = vmatpush3.msra.mxu0 %v3394_v31  ;;  %2998 = vmatpush3.msra.mxu1 %v3774_v56 }
  0xa2   :  { %3010 = vmatprep.subr.mxu0 %v3259_v1  ;;  %2999 = vmatprep.subr.mxu1 %v3259_v1 }
  0xa3   :  { %3011 = vmatpush3.msra.mxu0 %v3414_v35  ;;  %3000 = vmatpush3.msra.mxu1 %v3780_v8 }
  0xa4   :  { %3001 = vmatprep.mubr.msk.f32.mxu1 %vm4464_vm9, %v3259_v1  ;;  %3012 = vmatprep.subr.mxu0 %v3259_v1 }
  0xa5   :  { %3002 = vmatmul.mubr.f32.vlgmr.msra.gmra.mxu1 %v4023_v36  ;;  %3013 = vmatpush3.msra.mxu0 %v3426_v39 }
  0xa6   :  { %3039 = vmatprep.subr.mxu1 %v3259_v1  ;;  %3014 = vmatprep.subr.mxu0 %v3259_v1 }
  0xa7   :  { %3040 = vmatpush3.msk.msra.mxu1 %vm3319_vm11, %v4458_v2  ;;  %3015 = vmatpush3.msra.mxu0 %v3459_v47  ;;  %vm4476_vm11 = vnez %v4423_v26  ;;  %v4480_v47 = vld [vmem:[#allocation9_spill] sm:$0xff] }
  0xa8   :  { %3041 = vmatprep.subr.mxu1 %v3259_v1  ;;  %3016 = vmatprep.subr.mxu0 %v3259_v1 }
  0xa9   :  { %3042 = vmatpush3.msk.msra.mxu1 %vm3332_vm0, %v4458_v2  ;;  %3017 = vmatpush3.msra.mxu0 %v3506_v57 }
  0xaa   :  { %3043 = vmatprep.subr.mxu1 %v3259_v1  ;;  %3018 = vmatprep.subr.mxu0 %v3259_v1 }
  0xab   :  { %3044 = vmatpush3.msk.msra.mxu1 %vm3349_vm1, %v4458_v2  ;;  %3019 = vmatpush3.msra.mxu0 %v3549_v4 }
  0xac   :  { %3045 = vmatprep.subr.mxu1 %v3259_v1  ;;  %3020 = vmatprep.subr.mxu0 %v3259_v1 }
  0xad   :  { %3046 = vmatpush3.msk.msra.mxu1 %vm4476_vm11, %v4458_v2  ;;  %3021 = vmatpush3.msra.mxu0 %v3561_v9 }
  0xae   :  { %3047 = vmatprep.subr.mxu1 %v3259_v1  ;;  %3022 = vmatprep.subr.mxu0 %v3259_v1 }
  0xaf   :  { %3048 = vmatpush3.msk.msra.mxu1 %vm3387_vm4, %v4458_v2  ;;  %3023 = vmatpush3.msra.mxu0 %v3612_v28 }
  0xb0   :  { %3049 = vmatprep.subr.mxu1 %v3259_v1  ;;  %3024 = vmatprep.subr.mxu0 %v3259_v1 }
  0xb1   :  { %3050 = vmatpush3.msk.msra.mxu1 %vm4467_vm2, %v4458_v2  ;;  %3025 = vmatpush3.msra.mxu0 %v3614_v32 }
  0xb2   :  { %3051 = vmatprep.subr.mxu1 %v3259_v1  ;;  %3026 = vmatprep.subr.mxu0 %v3259_v1 }
  0xb3   :  { %3052 = vmatpush3.msk.msra.mxu1 %vm3439_vm10, %v4458_v2  ;;  %3027 = vmatpush3.msra.mxu0 %v3659_v61 }
  0xb4   :  { %3053 = vmatprep.subr.mxu1 %v3259_v1  ;;  %3028 = vmatprep.subr.mxu0 %v3259_v1 }
  0xb5   :  { %3054 = vmatpush3.msk.msra.mxu1 %vm4461_vm3, %v4458_v2  ;;  %3029 = vmatpush3.msra.mxu0 %v3691_v20 }
  0xb6   :  { %3055 = vmatprep.subr.mxu1 %v3259_v1  ;;  %3030 = vmatprep.subr.mxu0 %v3259_v1 }
  0xb7   :  { %3056 = vmatpush3.msk.msra.mxu1 %vm4466_vm5, %v4458_v2  ;;  %3031 = vmatpush3.msra.mxu0 %v3693_v24 }
  0xb8   :  { %3057 = vmatprep.subr.mxu1 %v3259_v1  ;;  %3032 = vmatprep.subr.mxu0 %v3259_v1 }
  0xb9   :  { %3058 = vmatpush3.msk.msra.mxu1 %vm4463_vm14, %v4458_v2  ;;  %3033 = vmatpush3.msra.mxu0 %v3722_v23 }
  0xba   :  { %3059 = vmatprep.subr.mxu1 %v3259_v1  ;;  %3034 = vmatprep.subr.mxu0 %v3259_v1 }
  0xbb   :  { %3060 = vmatpush3.msk.msra.mxu1 %vm3542_vm6, %v4458_v2  ;;  %3035 = vmatpush3.msra.mxu0 %v3724_v45 }
  0xbc   :  { %3036 = vmatprep.mubr.msk.f32.mxu0 %vm4464_vm9, %v3259_v1  ;;  %3061 = vmatprep.subr.mxu1 %v3259_v1 }
  0xbd   :  { %3037 = vmatmul.mubr.f32.vlgmr.msra.gmra.mxu0 %v4038_v48  ;;  %3062 = vmatpush3.msk.msra.mxu1 %vm3575_vm15, %v4458_v2 }
  0xbe   :  { %3074 = vmatprep.subr.mxu0 %v3259_v1  ;;  %3063 = vmatprep.subr.mxu1 %v3259_v1 }
  0xbf   :  { %3075 = vmatpush3.msra.mxu0 %v3392_v30  ;;  %3064 = vmatpush3.msk.msra.mxu1 %vm3608_vm12, %v4458_v2 }
  0xc0   :  { %3076 = vmatprep.subr.mxu0 %v3259_v1  ;;  %3065 = vmatprep.subr.mxu1 %v3259_v1 }
  0xc1   :  { %3077 = vmatpush3.msra.mxu0 %v3412_v34  ;;  %3066 = vmatpush3.msk.msra.mxu1 %vm3626_vm8, %v4458_v2 }
  0xc2   :  { %3078 = vmatprep.subr.mxu0 %v3259_v1  ;;  %3067 = vmatprep.subr.mxu1 %v3259_v1 }
  0xc3   :  { %3079 = vmatpush3.msra.mxu0 %v3424_v38  ;;  %3068 = vmatpush3.msk.msra.mxu1 %vm3653_vm7, %v4458_v2  ;;  %vm4477_vm7 = vnez %v4417_v14  ;;  %v4479_v38 = vld [vmem:[#allocation8_spill] sm:$0xff] }
  0xc4   :  { %3080 = vmatprep.subr.mxu0 %v3259_v1  ;;  %3069 = vmatprep.subr.mxu1 %v3259_v1  ;;  %v132_v39 = vmul.u32 32, %v4479_v38  ;;  %v134_v41 = vadd.s32 1, %v4479_v38 }
  0xc5   :  { %3081 = vmatpush3.msra.mxu0 %v3444_v42  ;;  %3070 = vmatpush3.msk.msra.mxu1 %vm3672_vm13, %v4458_v2 }
  0xc6   :  { %3071 = vmatprep.mubr.msk.f32.mxu1 %vm4464_vm9, %v3259_v1  ;;  %3082 = vmatprep.subr.mxu0 %v3259_v1  ;;  %v135_v49 = vmul.u32 32, %v134_v41 }
  0xc7   :  { %3072 = vmatmul.mubr.f32.vlgmr.msra.gmra.mxu1 %v865_v10  ;;  %3083 = vmatpush3.msra.mxu0 %v3457_v46 }
  0xc8   :  { %3109 = vmatprep.subr.mxu1 %v3259_v1  ;;  %3084 = vmatprep.subr.mxu0 %v3259_v1 }
  0xc9   :  { %3110 = vmatpush3.msk.msra.mxu1 %vm4477_vm7, %v4458_v2  ;;  %3085 = vmatpush3.msra.mxu0 %v3495_v54 }
  0xca   :  { %3111 = vmatprep.subr.mxu1 %v3259_v1  ;;  %3086 = vmatprep.subr.mxu0 %v3259_v1 }
  0xcb   :  { %3112 = vmatpush3.msk.msra.mxu1 %vm3332_vm0, %v4458_v2  ;;  %3087 = vmatpush3.msra.mxu0 %v3547_v0  ;;  %vm4478_vm0 = vnez %v4454_v60 }
  0xcc   :  { %3113 = vmatprep.subr.mxu1 %v3259_v1  ;;  %3088 = vmatprep.subr.mxu0 %v3259_v1 }
  0xcd   :  { %3114 = vmatpush3.msk.msra.mxu1 %vm3349_vm1, %v4458_v2  ;;  %3089 = vmatpush3.msra.mxu0 %v3580_v13  ;;  %vm136_vm1 = vcmp.lt.s32.totalorder %v4480_v47, %v135_v49 }
  0xce   :  { %3115 = vmatprep.subr.mxu1 %v3259_v1  ;;  %3090 = vmatprep.subr.mxu0 %v3259_v1 }
  0xcf   :  { %3116 = vmatpush3.msk.msra.mxu1 %vm4476_vm11, %v4458_v2  ;;  %3091 = vmatpush3.msra.mxu0 %v3587_v17  ;;  %vm133_vm11 = vcmp.ge.s32.totalorder %v4480_v47, %v132_v39 }
  0xd0   :  { %3117 = vmatprep.subr.mxu1 %v3259_v1  ;;  %3092 = vmatprep.subr.mxu0 %v3259_v1 }
  0xd1   :  { %3118 = vmatpush3.msk.msra.mxu1 %vm3387_vm4, %v4458_v2  ;;  %3093 = vmatpush3.msra.mxu0 %v3642_v50  ;;  %vm137_vm4 = vmand %vm133_vm11, %vm136_vm1 }
  0xd2   :  { %3119 = vmatprep.subr.mxu1 %v3259_v1  ;;  %3094 = vmatprep.subr.mxu0 %v3259_v1  ;;  %v4316_v54 = vsel %vm137_vm4, 1.0, %v3259_v1 }
  0xd3   :  { %3120 = vmatpush3.msk.msra.mxu1 %vm4467_vm2, %v4458_v2  ;;  %3095 = vmatpush3.msra.mxu0 %v3645_v53  ;;  %vm1442_vm2 = vcmask 1043456  }
  0xd4   :  { %3121 = vmatprep.subr.mxu1 %v3259_v1  ;;  %3096 = vmatprep.subr.mxu0 %v3259_v1  ;;  %v1444_v57 = vsel %vm1442_vm2, %v4316_v54, 0 }
  0xd5   :  { %3122 = vmatpush3.msk.msra.mxu1 %vm3439_vm10, %v4458_v2  ;;  %3097 = vmatpush3.msra.mxu0 %v3685_v18  ;;  %v4322_v59 = vsub.f32 %v1444_v57, %v1444_v57 }
  0xd6   :  { %3123 = vmatprep.subr.mxu1 %v3259_v1  ;;  %3098 = vmatprep.subr.mxu0 %v3259_v1 }
  0xd7   :  { %3124 = vmatpush3.msk.msra.mxu1 %vm4461_vm3, %v4458_v2  ;;  %3099 = vmatpush3.msra.mxu0 %v3713_v5  ;;  %v4326_v63 = vand.u32 4294901760, %v4322_v59 }
  0xd8   :  { %3125 = vmatprep.subr.mxu1 %v3259_v1  ;;  %3100 = vmatprep.subr.mxu0 %v3259_v1 }
  0xd9   :  { %3126 = vmatpush3.msk.msra.mxu1 %vm4466_vm5, %v4458_v2  ;;  %3101 = vmatpush3.msra.mxu0 %v3716_v15  ;;  %v1556_v0 = vsub.f32 %v4322_v59, %v4326_v63 }
  0xda   :  { %3127 = vmatprep.subr.mxu1 %v3259_v1  ;;  %3102 = vmatprep.subr.mxu0 %v3259_v1 }
  0xdb   :  { %3128 = vmatpush3.msk.msra.mxu1 %vm4463_vm14, %v4458_v2  ;;  %3103 = vmatpush3.msra.mxu0 %v3740_v3  ;;  %v1557_v4 = vand.u32 4294901760, %v1556_v0 }
  0xdc   :  { %3129 = vmatprep.subr.mxu1 %v3259_v1  ;;  %3104 = vmatprep.subr.mxu0 %v3259_v1 }
  0xdd   :  { %3130 = vmatpush3.msk.msra.mxu1 %vm3542_vm6, %v4458_v2  ;;  %3105 = vmatpush3.msra.mxu0 %v3749_v43  ;;  %vm1438_vm6 = vcmask 31744  }
  0xde   :  { %3106 = vmatprep.mubr.msk.f32.mxu0 %vm4464_vm9, %v3259_v1  ;;  %3131 = vmatprep.subr.mxu1 %v3259_v1 }
  0xdf   :  { %3107 = vmatmul.mubr.f32.vlgmr.msra.gmra.mxu0 %v4023_v36  ;;  %3132 = vmatpush3.msk.msra.mxu1 %vm3575_vm15, %v4458_v2 }
  0xe0   :  { %3141 = vmatprep.mubr.msk.f32.mxu1 %vm4464_vm9, %v3259_v1  ;;  %3133 = vmatprep.subr.mxu1 %v3259_v1 }
  0xe1   :  { %3144 = vmatprep.subr.mxu0 %v3259_v1  ;;  %3134 = vmatpush3.msk.msra.mxu1 %vm3608_vm12, %v4458_v2 }
  0xe2   :  { %3146 = vmatprep.mubr.msk.f32.mxu0 %vm4464_vm9, %v3259_v1  ;;  %3135 = vmatprep.subr.mxu1 %v3259_v1 }
  0xe3   :  { %3136 = vmatpush3.msk.msra.mxu1 %vm3626_vm8, %v4458_v2  ;;  %3145 = vmatpush3.msk.msra.mxu0 %vm1442_vm2, %v4316_v54 }
  0xe4   :  { %3137 = vmatprep.subr.mxu1 %v3259_v1  ;;  %3154 = vmatprep.subr.mxu0 %v3259_v1 }
  0xe5   :  { %3138 = vmatpush3.msk.msra.mxu1 %vm4478_vm0, %v4458_v2 }
  0xe6   :  { %3139 = vmatprep.subr.mxu1 %v3259_v1 }
  0xe7   :  { %3140 = vmatpush3.msk.msra.mxu1 %vm3672_vm13, %v4458_v2 }
  0xe8   :  { %3142 = vmatmul.mubr.f32.vlgmr.msra.gmra.mxu1 %v4023_v36  ;;  %3149 = vmatprep.subr.mxu1 %v3259_v1 }
  0xe9   :  { %3151 = vmatprep.mubr.msk.f32.mxu1 %vm4464_vm9, %v3259_v1  ;;  %3150 = vmatpush3.msra.mxu1 %v1557_v4 }
  0xea   :  { %3159 = vmatprep.subr.mxu1 %v3259_v1 }
  0xf6   :  { %v227_v14 = vpop.f32.mrf.mxu0 }
  0xf8   :  { %v2758_v15 = vpop.f32.mrf.mxu0 }
  0xff   :  { %v378_v16 = vpop.f32.mrf.mxu1 }
 0x100   :  { %v379_v21 = vadd.f32 %v378_v16, %v227_v14 }
 0x101   :  { %v2793_v22 = vpop.f32.mrf.mxu1 }
 0x117   :  { %v482_v26 = vpop.f32.mrf.mxu0 }
 0x118   :  { %v483_v27 = vadd.f32 %v482_v26, %v379_v21 }
 0x119   :  { %v2828_v29 = vpop.f32.mrf.mxu0 }
 0x121   :  { %v571_v30 = vpop.f32.mrf.mxu1 }
 0x122   :  { %v572_v31 = vadd.f32 %v571_v30, %v483_v27 }
 0x123   :  { %v2863_v33 = vpop.f32.mrf.mxu1 }
 0x139   :  { %v690_v34 = vpop.f32.mrf.mxu0 }
 0x13a   :  { %v691_v2 = vadd.f32 %v690_v34, %v572_v31 }
 0x13b   :  { %v2898_v35 = vpop.f32.mrf.mxu0 }
 0x143   :  { %v777_v42 = vpop.f32.mrf.mxu1 }
 0x144   :  { %v778_v46 = vadd.f32 %v777_v42, %v691_v2 }
 0x145   :  { %v2933_v52 = vpop.f32.mrf.mxu1 }
 0x146   :  { %v1423_v60 = vmul.f32 0.03125, %v778_v46 }
 0x148   :  { %v1424_v20 = vmul.f32 %v1423_v60, %v778_v46 }
 0x15c   :  { %v869_v9 = vpop.f32.mrf.mxu0 }
 0x15e   :  { %v2968_v11 = vpop.f32.mrf.mxu0 }
 0x165   :  { %v1020_v13 = vpop.f32.mrf.mxu1 }
 0x166   :  { %v1021_v50 = vadd.f32 %v1020_v13, %v869_v9 }
 0x167   :  { %v3003_v17 = vpop.f32.mrf.mxu1 }
 0x17d   :  { %v1124_v23 = vpop.f32.mrf.mxu0 }
 0x17e   :  { %v1125_v53 = vadd.f32 %v1124_v23, %v1021_v50 }
 0x17f   :  { %v3038_v25 = vpop.f32.mrf.mxu0 }
 0x187   :  { %v1213_v28 = vpop.f32.mrf.mxu1 }
 0x188   :  { %v1214_v61 = vadd.f32 %v1213_v28, %v1125_v53 }
 0x189   :  { %v3073_v32 = vpop.f32.mrf.mxu1 }
 0x19f   :  { %v1332_v40 = vpop.f32.mrf.mxu0 }
 0x1a0   :  { %v1333_v7 = vadd.f32 %v1332_v40, %v1214_v61 }
 0x1a1   :  { %v3108_v45 = vpop.f32.mrf.mxu0 }
 0x1a8   :  { %v1419_v18 = vpop.f32.mrf.mxu1 }
 0x1a9   :  { %v1420_v24 = vadd.f32 %v1419_v18, %v1333_v7  ;;  %v2494_v18 = vld [vmem:[%s4383_s1] ss:$0 sm:$0xff] }
 0x1aa   :  { %v3143_v37 = vpop.f32.mrf.mxu1 }
 0x1ab   :  { %v1425_v5 = vsub.f32 %v1420_v24, %v1424_v20  ;;  %v2495_v24 = vld [vmem:[%s4384_s2] ss:$0 sm:$0xff] }
 0x1ad   :  { %v1426_v3 = vmul.f32 0.032258064, %v1425_v5 }
 0x1af   :  { %v1427_v6 = vmax.f32 %v1426_v3, 0.0 }
 0x1b1   :  { %3209 = vrsqrt.f32 %v1427_v6  ;;  %vm1430_vm5 = vcmp.eq.f32.partialorder %v1427_v6, inf  ;;  %v1433_v56 = vand.u32 2147483648, %v1427_v6  ;;  %vm1432_vm10 = vcmp.eq.f32.partialorder %v1427_v6, 0.0 }
 0x1be   :  { %v3210_v43 = vpop.eup %3209 }
 0x1bf   :  { %v1429_v58 = vmul.f32 %v3210_v43, %v1427_v6 }
 0x1c1   :  { %v1431_v8 = vsel %vm1430_vm5, %v1427_v6, %v1429_v58 }
 0x1c2   :  { %v1434_v36 = vsel %vm1432_vm10, %v1433_v56, %v1431_v8 }
 0x1c3   :  { %v1435_v48 = vadd.f32 1e-06, %v1434_v36 }
 0x1c5   :  { %3211 = vrcp.f32 %v1435_v48 }
 0x1d2   :  { %v3212_v10 = vpop.eup %3211 }
 0x1d3   :  { %v1440_v55 = vsel %vm1438_vm6, %v3212_v10, 0  ;;  %v1892_v19 = vmul.f32 %v3212_v10, %v1423_v60  ;;  %v3213_v60 = vld [vmem:[#allocation2] sm:$0xf] }
 0x1d4   :  { %v1512_v44 = vand.u32 4294901760, %v1440_v55 }
 0x1d5   :  { %v1893_v51 = vsub.f32 0.0, %v1892_v19 }
 0x1d6   :  { %v1513_v62 = vsub.f32 %v1440_v55, %v1512_v44  ;;  %3152 = vmatmul.mubr.f32.vlgmr.msra.gmra.mxu1 %v1512_v44 }
 0x1d7   :  { %3160 = vmatpush3.msk.msra.mxu1 %vm1442_vm2, %v4316_v54  ;;  %3161 = vmatprep.mubr.msk.f32.mxu1 %vm4464_vm9, %v3259_v1  ;;  %v1895_v12 = vsel %vm1438_vm6, %v1893_v51, 0 }
 0x1d8   :  { %v1514_v14 = vand.u32 4294901760, %v1513_v62  ;;  %3169 = vmatprep.subr.mxu1 %v3259_v1  ;;  %v1963_v15 = vand.u32 4294901760, %v1895_v12 }
 0x1da   :  { %3162 = vmatmul.mubr.f32.vlgmr.msra.gmra.mxu1 %v1514_v14  ;;  %v1515_v16 = vsub.f32 %v1513_v62, %v1514_v14  ;;  %v1964_v22 = vsub.f32 %v1895_v12, %v1963_v15 }
 0x1db   :  { %3170 = vmatpush3.msk.msra.mxu1 %vm1442_vm2, %v4316_v54  ;;  %3171 = vmatprep.mubr.msk.f32.mxu1 %vm4464_vm9, %v3259_v1 }
 0x1dc   :  { %v1516_v21 = vand.u32 4294901760, %v1515_v16  ;;  %3179 = vmatprep.subr.mxu1 %v3259_v1  ;;  %v1965_v26 = vand.u32 4294901760, %v1964_v22 }
 0x1de   :  { %3147 = vmatmul.mubr.f32.vlgmr.msra.gmra.mxu0 %v1516_v21  ;;  %3172 = vmatmul.mubr.f32.vlgmr.msra.gmra.mxu1 %v1512_v44  ;;  %v1966_v27 = vsub.f32 %v1964_v22, %v1965_v26 }
 0x1df   :  { %3155 = vmatpush3.msra.mxu0 %v4322_v59  ;;  %3156 = vmatprep.mubr.msk.f32.mxu0 %vm4464_vm9, %v3259_v1 }
 0x1e0   :  { %3164 = vmatprep.subr.mxu0 %v3259_v1  ;;  %3180 = vmatpush3.msra.mxu1 %v1557_v4  ;;  %v1967_v29 = vand.u32 4294901760, %v1966_v27 }
 0x1e1   :  { %3181 = vmatprep.mubr.msk.f32.mxu1 %vm4464_vm9, %v3259_v1  ;;  %3189 = vmatprep.subr.mxu1 %v3259_v1 }
 0x1e2   :  { %3157 = vmatmul.mubr.f32.vlgmr.msra.gmra.mxu0 %v1513_v62  ;;  %3182 = vmatmul.mubr.f32.vlgmr.msra.gmra.mxu1 %v1963_v15 }
 0x1e3   :  { %3165 = vmatpush3.msra.mxu0 %v4326_v63  ;;  %3166 = vmatprep.mubr.msk.f32.mxu0 %vm4464_vm9, %v3259_v1 }
 0x1e4   :  { %3174 = vmatprep.subr.mxu0 %v3259_v1  ;;  %3190 = vmatpush3.msk.msra.mxu1 %vm1442_vm2, %v4316_v54 }
 0x1e5   :  { %3191 = vmatprep.mubr.msk.f32.mxu1 %vm4464_vm9, %v3259_v1  ;;  %3199 = vmatprep.subr.mxu1 %v3259_v1 }
 0x1e6   :  { %3167 = vmatmul.mubr.f32.vlgmr.msra.gmra.mxu0 %v1512_v44  ;;  %3192 = vmatmul.mubr.f32.vlgmr.msra.gmra.mxu1 %v1965_v26 }
 0x1e7   :  { %3175 = vmatpush3.msk.msra.mxu0 %vm1442_vm2, %v4316_v54  ;;  %3176 = vmatprep.mubr.msk.f32.mxu0 %vm4464_vm9, %v3259_v1 }
 0x1e8   :  { %3184 = vmatprep.subr.mxu0 %v3259_v1  ;;  %3200 = vmatpush3.msk.msra.mxu1 %vm1442_vm2, %v4316_v54 }
 0x1e9   :  { %3201 = vmatprep.mubr.msk.f32.mxu1 %vm4464_vm9, %v3259_v1 }
 0x1ea   :  { %3177 = vmatmul.mubr.f32.vlgmr.msra.gmra.mxu0 %v1967_v29  ;;  %3202 = vmatmul.mubr.f32.vlgmr.msra.gmra.mxu1 %v1963_v15 }
 0x1eb   :  { %3185 = vmatpush3.msra.mxu0 %v4322_v59  ;;  %3186 = vmatprep.mubr.msk.f32.mxu0 %vm4464_vm9, %v3259_v1 }
 0x1ec   :  { %3194 = vmatprep.subr.mxu0 %v3259_v1 }
 0x1ee   :  { %3187 = vmatmul.mubr.f32.vlgmr.msra.gmra.mxu0 %v1964_v22 }
 0x1ef   :  { %3195 = vmatpush3.msra.mxu0 %v4326_v63  ;;  %3196 = vmatprep.mubr.msk.f32.mxu0 %vm4464_vm9, %v3259_v1 }
 0x1f2   :  { %3197 = vmatmul.mubr.f32.vlgmr.msra.gmra.mxu0 %v1963_v15 }
 0x296   :  { %v1594_v30 = vpop.f32.mrf.mxu1 }
 0x298   :  { %v3153_v31 = vpop.f32.mrf.mxu1 }
 0x29a   :  { %v1742_v33 = vpop.f32.mrf.mxu1 }
 0x29c   :  { %v3163_v34 = vpop.f32.mrf.mxu1 }
 0x29e   :  { %v1518_v2 = vpop.f32.mrf.mxu0  ;;  %v1888_v35 = vpop.f32.mrf.mxu1 }
 0x29f   :  { %v1595_v46 = vadd.f32 %v1594_v30, %v1518_v2 }
 0x2a0   :  { %v3148_v38 = vpop.f32.mrf.mxu0  ;;  %v3173_v39 = vpop.f32.mrf.mxu1 }
 0x2a2   :  { %v1668_v41 = vpop.f32.mrf.mxu0  ;;  %v2045_v42 = vpop.f32.mrf.mxu1 }
 0x2a3   :  { %v1669_v52 = vadd.f32 %v1668_v41, %v1595_v46 }
 0x2a4   :  { %v3158_v47 = vpop.f32.mrf.mxu0  ;;  %v3183_v49 = vpop.f32.mrf.mxu1 }
 0x2a5   :  { %v1743_v1 = vadd.f32 %v1742_v33, %v1669_v52 }
 0x2a6   :  { %v1816_v54 = vpop.f32.mrf.mxu0  ;;  %v2193_v57 = vpop.f32.mrf.mxu1 }
 0x2a7   :  { %v1817_v13 = vadd.f32 %v1816_v54, %v1743_v1 }
 0x2a8   :  { %v3168_v59 = vpop.f32.mrf.mxu0  ;;  %v3193_v63 = vpop.f32.mrf.mxu1 }
 0x2a9   :  { %v1889_v32 = vadd.f32 %v1888_v35, %v1817_v13 }
 0x2aa   :  { %v1969_v0 = vpop.f32.mrf.mxu0  ;;  %v2339_v4 = vpop.f32.mrf.mxu1 }
 0x2ab   :  { %v2046_v17 = vadd.f32 %v2045_v42, %v1969_v0  ;;  %v2343_v61 = vmul.f32 %v3213_v60, %v1889_v32 }
 0x2ac   :  { %v3178_v9 = vpop.f32.mrf.mxu0  ;;  %v3203_v11 = vpop.f32.mrf.mxu1 }
 0x2ae   :  { %v2119_v23 = vpop.f32.mrf.mxu0 }
 0x2af   :  { %v2120_v25 = vadd.f32 %v2119_v23, %v2046_v17 }
 0x2b0   :  { %v3188_v28 = vpop.f32.mrf.mxu0 }
 0x2b1   :  { %v2194_v40 = vadd.f32 %v2193_v57, %v2120_v25 }
 0x2b2   :  { %v2267_v45 = vpop.f32.mrf.mxu0 }
 0x2b3   :  { %v2268_v50 = vadd.f32 %v2267_v45, %v2194_v40 }
 0x2b4   :  { %v3198_v53 = vpop.f32.mrf.mxu0 }
 0x2b5   :  { %v2340_v7 = vadd.f32 %v2339_v4, %v2268_v50 }
 0x2b7   :  { %v2344_v20 = vadd.f32 %v2343_v61, %v2340_v7 }
 0x2b9   :  { %v2351_v37 = vmul.f32 %v2494_v18, %v2344_v20 }
 0x2bb   :  { %v2358_v5 = vadd.f32 %v2495_v24, %v2351_v37 }
 0x2bd   :  { %2359 = vst [vmem:[#allocation5] sm:$0xf] %v2358_v5 }
 0x2be   :  { %3245 = shalt.err (!%p3242_p9)
}
 0x2bf   :  { %2369 = dma.vmem_to_hbm [thread:$0]  %s2367_s21, 64, %s4385_s3, [#allocation4]  }
 0x2c0   :  { %3256 = dma.done.wait [#allocation4], 64  }
 0x2c1   :  { %3257 = vsyncadd [#allocation4], 4294967232 }
 0x2c2   :  { %2373 = vsyncpa [#allocation3], 1 }
 0x2c3   :  { %2374 = vsyncpa [#allocation4], 1 }

</bundles_post_ra>
